<compile_context>
chip_gen: v7x
topology: tpu7x:2x2x1
jax: 0.10.0
libtpu: 0.0.40
codegen_flags: <defaults>
</compile_context>

<pallas_src>
import functools
import math

import jax
import jax.numpy as jnp
import numpy as np
from jax import lax
from jax.experimental import pallas as pl
from jax.experimental.pallas import tpu as pltpu


def _msc_kernel(feats_ref, cb_ref, mask_ref, out_ref, *, const):
    tb, L, d = feats_ref.shape
    n = cb_ref.shape[0]

    cb = cb_ref[...]                                     # (N, D) compute dtype

    # Fold mask * (1 / (sqrt(D) * T)) into q before the matmul (mask is {0,1}).
    mconst = (mask_ref[...] * const).astype(cb.dtype)    # (TB, L)
    q = feats_ref[...] * mconst[:, :, None]              # (TB, L, D)

    # scores[b*L + l, j] = <q_{b,l}, cb_j>   (one big MXU matmul, f32 accum)
    scores = lax.dot_general(q.reshape(tb * L, d), cb,
                             (((1,), (1,)), ((), ())),
                             preferred_element_type=jnp.float32)   # (TB*L, N)

    # Per-batch max over the sequence axis.
    z = jnp.max(scores.reshape(tb, L, n), axis=1)                  # (TB, N) f32

    # ---- sparsemax along the code axis (sort-free, O(N^2)), all in f32 ----
    # NOTE: for very large codebooks (N >= ~2048, esp. v7x 64 MiB VMEM) replace
    # this pairwise form with a tau-bisection solve to avoid the (TB, N, N)
    # intermediate; at typical codebook sizes it is cheap and exact.
    z = z - jnp.max(z, axis=-1, keepdims=True)
    geq = (z[:, :, None] >= z[:, None, :]).astype(jnp.float32)     # (TB, N, N)
    # kcount[b, j] = |{i : z_i >= z_j}|,  scum[b, j] = sum_{z_i >= z_j} z_i
    # computed as batched MXU matmuls (the MXU is idle here) instead of
    # cross-sublane XLU reductions plus a (TB, N, N) elementwise multiply.
    dn = (((2,), (1,)), ((0,), (0,)))
    ones_lhs = jnp.ones((tb, 1, n), jnp.float32)
    kcount = lax.dot_general(ones_lhs, geq, dn,
                             preferred_element_type=jnp.float32)[:, 0, :]
    scum = lax.dot_general(z[:, None, :], geq, dn,
                           preferred_element_type=jnp.float32)[:, 0, :]
    supp = (1.0 + kcount * z) > scum                               # support set
    kstar = jnp.max(jnp.where(supp, kcount, 0.0), axis=-1, keepdims=True)
    sstar = jnp.max(jnp.where(supp & (kcount >= kstar), scum, -1e30),
                    axis=-1, keepdims=True)
    tau = (sstar - 1.0) / kstar
    w = jnp.maximum(z - tau, 0.0)                                  # (TB, N)

    # attn_feats = w @ codebook  ->  (TB, D), lane/row-dense store.
    out = jnp.dot(w.astype(cb.dtype), cb, preferred_element_type=jnp.float32)
    out_ref[...] = out.astype(out_ref.dtype)


def modality_shared_codebook(feats, codebook, mask=None, T=1000.0, *,
                             block_b=16, compute_dtype=jnp.bfloat16):
    """Pallas implementation of Modality_Shared_Codebook.forward.

    compute_dtype: dtype used for the MXU matmul inputs (bf16 default per the
    perf review; use jnp.float32 to reproduce the f32 reference exactly, or
    None to use feats.dtype as-is).  Sparsemax math is always f32.
    """
    B, L, D = feats.shape
    N, D2 = codebook.shape
    assert D == D2, "feats feature dim must equal code_dim"

    if compute_dtype is None:
        compute_dtype = feats.dtype
    feats_c = feats.astype(compute_dtype)
    cb_c = codebook.astype(compute_dtype)

    if mask is None:
        mask2 = jnp.ones((B, L), jnp.float32)
    else:
        mask2 = mask.astype(jnp.float32).reshape(B, L)

    # Batch tile: one step covering the whole (small) batch, or 8-aligned tiles
    # (sublane constraint on the 2-D mask / output blocks) with zero padding.
    if block_b >= B:
        tb = B
    else:
        tb = max(8, (block_b // 8) * 8)
    b_pad = ((B + tb - 1) // tb) * tb
    if b_pad != B:
        feats_c = jnp.pad(feats_c, ((0, b_pad - B), (0, 0), (0, 0)))
        mask2 = jnp.pad(mask2, ((0, b_pad - B), (0, 0)))

    kernel = functools.partial(_msc_kernel, const=1.0 / (math.sqrt(D) * T))

    flops = 2 * b_pad * L * N * D + 2 * b_pad * N * D + 4 * b_pad * N * N
    bytes_accessed = (feats_c.size * feats_c.dtype.itemsize
                      + cb_c.size * cb_c.dtype.itemsize
                      + mask2.size * mask2.dtype.itemsize
                      + b_pad * D * 4)

    out = pl.pallas_call(
        kernel,
        out_shape=jax.ShapeDtypeStruct((b_pad, D), jnp.float32),
        grid_spec=pltpu.PrefetchScalarGridSpec(
            num_scalar_prefetch=0,
            grid=(b_pad // tb,),
            in_specs=[
                pl.BlockSpec((tb, L, D), lambda b: (b, 0, 0)),   # feats slab
                # Codebook is grid-invariant and stays resident in VMEM.
                # (For very large codebooks on v7x it can be single-buffered
                # via pipeline_mode=pl.Buffered(1) to halve its VMEM cost.)
                pl.BlockSpec((N, D), lambda b: (0, 0)),
                pl.BlockSpec((tb, L), lambda b: (b, 0)),         # lane-major mask
            ],
            out_specs=pl.BlockSpec((tb, D), lambda b: (b, 0)),   # lane/row-dense
        ),
        compiler_params=pltpu.CompilerParams(
            dimension_semantics=("parallel",)),
        cost_estimate=pl.CostEstimate(flops=int(flops), transcendentals=0,
                                      bytes_accessed=int(bytes_accessed)),
    )(feats_c, cb_c, mask2)
    return out[:B]


# ---------------- pure-JAX reference (mirrors the PyTorch code) ----------------
def _sparsemax_ref(z):
    z = z - jnp.max(z, axis=-1, keepdims=True)
    zs = -jnp.sort(-z, axis=-1)                       # descending sort
    n = z.shape[-1]
    r = jnp.arange(1, n + 1, dtype=z.dtype)
    bound = 1.0 + r * zs
    cz = jnp.cumsum(zs, axis=-1)
    is_gt = (bound > cz).astype(z.dtype)
    k = jnp.max(is_gt * r, axis=-1, keepdims=True)
    s = jnp.sum(is_gt * zs, axis=-1, keepdims=True)
    tau = (s - 1.0) / k
    return jnp.maximum(z - tau, 0.0)


def _ref_forward(feats, codebook, mask=None, T=1000.0):
    D = codebook.shape[1]
    k = jnp.transpose(codebook[None], (0, 2, 1))      # (1, D, N)
    attn = jnp.matmul(feats, k) / math.sqrt(D)        # (B, L, N)
    if mask is not None:
        attn = attn * mask[..., None]
    attn = attn / T
    attn = jnp.max(attn, axis=1)                      # (B, N)
    w = _sparsemax_ref(attn)
    return w @ codebook                               # (B, D)


if __name__ == "__main__":
    B, L, N, D = 2, 8, 16, 32     # batch, seq, num_codes, code_dim
    key = jax.random.PRNGKey(0)
    k1, k2, k3 = jax.random.split(key, 3)
    feats = jax.random.normal(k1, (B, L, D), dtype=jnp.float32)
    codebook = jax.random.normal(k2, (N, D), dtype=jnp.float32)
    mask = (jax.random.uniform(k3, (B, L)) > 0.3).astype(jnp.float32)

    ref_nomask = _ref_forward(feats, codebook, None)
    ref_mask = _ref_forward(feats, codebook, mask)

    # Exact-path checks (f32 matmul inputs) against the PyTorch-equivalent ref.
    out_f32_nomask = jax.block_until_ready(
        modality_shared_codebook(feats, codebook, None, compute_dtype=jnp.float32))
    out_f32_mask = jax.block_until_ready(
        modality_shared_codebook(feats, codebook, mask, compute_dtype=jnp.float32))
    assert np.allclose(np.asarray(out_f32_nomask), np.asarray(ref_nomask),
                       atol=2e-5, rtol=2e-5)
    assert np.allclose(np.asarray(out_f32_mask), np.asarray(ref_mask),
                       atol=2e-5, rtol=2e-5)

    # Default fast path: bf16 matmul inputs, f32 sparsemax / accumulation.
    out_bf16 = jax.block_until_ready(modality_shared_codebook(feats, codebook, mask))
    assert np.allclose(np.asarray(out_bf16), np.asarray(ref_mask),
                       atol=2e-2, rtol=2e-2)

    # Larger batch exercising batch tiling + padding (B=12, TB=8 -> pad to 16).
    B2 = 12
    k4, k5 = jax.random.split(jax.random.PRNGKey(1), 2)
    feats2 = jax.random.normal(k4, (B2, L, D), dtype=jnp.float32)
    mask2 = (jax.random.uniform(k5, (B2, L)) > 0.3).astype(jnp.float32)
    out2 = jax.block_until_ready(
        modality_shared_codebook(feats2, codebook, mask2,
                                 block_b=8, compute_dtype=jnp.float32))
    ref2 = _ref_forward(feats2, codebook, mask2)
    assert np.allclose(np.asarray(out2), np.asarray(ref2), atol=2e-5, rtol=2e-5)

    print("KERNEL_OK")
</pallas_src>

<mosaic_0001>
module attributes {stable_mosaic.version = 11 : i64} {
  func.func @_msc_kernel(%arg0: i32, %arg1: memref<2x8x32xf32, #tpu.memory_space<vmem>>, %arg2: memref<16x32xf32, #tpu.memory_space<vmem>>, %arg3: memref<2x8xf32, #tpu.memory_space<vmem>>, %arg4: memref<2x32xf32, #tpu.memory_space<vmem>>) attributes {dimension_semantics = [#tpu.dimension_semantics<parallel>], iteration_bounds = array<i64: 1>, scalar_prefetch = 0 : i64, scratch_operands = 0 : i64, tpu.core_type = #tpu.core_type<tc>, window_params = [{transform_indices = @transform_0, window_bounds = array<i64: 2, 8, 32>}, {pipeline_mode = #tpu.pipeline_mode<synchronous>, transform_indices = @transform_1, window_bounds = array<i64: 16, 32>}, {transform_indices = @transform_2, window_bounds = array<i64: 2, 8>}, {transform_indices = @transform_3, window_bounds = array<i64: 2, 32>}]} {
    %c0 = arith.constant 0 : index
    %c0_0 = arith.constant 0 : index
    %0 = vector.load %arg2[%c0, %c0_0] : memref<16x32xf32, #tpu.memory_space<vmem>>, vector<16x32xf32>
    %c0_1 = arith.constant 0 : index
    %c0_2 = arith.constant 0 : index
    %1 = vector.load %arg3[%c0_1, %c0_2] : memref<2x8xf32, #tpu.memory_space<vmem>>, vector<2x8xf32>
    %cst = arith.constant 1.76776695E-4 : f32
    %2 = vector.broadcast %cst : f32 to vector<2x8xf32>
    %3 = arith.mulf %1, %2 : vector<2x8xf32>
    %c0_3 = arith.constant 0 : index
    %c0_4 = arith.constant 0 : index
    %c0_5 = arith.constant 0 : index
    %4 = vector.load %arg1[%c0_3, %c0_4, %c0_5] : memref<2x8x32xf32, #tpu.memory_space<vmem>>, vector<2x8x32xf32>
    %5 = vector.shape_cast %3 : vector<2x8xf32> to vector<2x8x1xf32>
    %6 = vector.broadcast %5 : vector<2x8x1xf32> to vector<2x8x32xf32>
    %7 = arith.mulf %4, %6 : vector<2x8x32xf32>
    %8 = vector.shape_cast %7 : vector<2x8x32xf32> to vector<16x32xf32>
    %cst_6 = arith.constant dense<0.000000e+00> : vector<16x16xf32>
    %9 = tpu.matmul %8, %0, %cst_6 {dimension_numbers = #tpu.dot_dimension_numbers<[1], [1], [0], [0], [0, 0, 1, 0], [], []>} : vector<16x32xf32>, vector<16x32xf32>, vector<16x16xf32> -> vector<16x16xf32>
    %10 = vector.shape_cast %9 : vector<16x16xf32> to vector<2x8x16xf32>
    %cst_7 = arith.constant dense<0xFF800000> : vector<2x16xf32>
    %11 = vector.multi_reduction <maximumf>, %10, %cst_7 [1] : vector<2x8x16xf32> to vector<2x16xf32>
    %cst_8 = arith.constant dense<0xFF800000> : vector<2xf32>
    %12 = vector.multi_reduction <maximumf>, %11, %cst_8 [1] : vector<2x16xf32> to vector<2xf32>
    %13 = vector.shape_cast %12 : vector<2xf32> to vector<2x1xf32>
    %14 = vector.broadcast %13 : vector<2x1xf32> to vector<2x16xf32>
    %15 = arith.subf %11, %14 : vector<2x16xf32>
    %16 = vector.shape_cast %15 : vector<2x16xf32> to vector<2x16x1xf32>
    %17 = vector.shape_cast %15 : vector<2x16xf32> to vector<2x1x16xf32>
    %18 = vector.broadcast %16 : vector<2x16x1xf32> to vector<2x16x16xf32>
    %19 = vector.broadcast %17 : vector<2x1x16xf32> to vector<2x16x16xf32>
    %20 = arith.cmpf oge, %18, %19 : vector<2x16x16xf32>
    %21 = arith.extui %20 : vector<2x16x16xi1> to vector<2x16x16xi32>
    %22 = arith.sitofp %21 : vector<2x16x16xi32> to vector<2x16x16xf32>
    %cst_9 = arith.constant 1.000000e+00 : f32
    %23 = vector.broadcast %cst_9 : f32 to vector<2x1x16xf32>
    %cst_10 = arith.constant dense<0.000000e+00> : vector<2x1x16xf32>
    %24 = tpu.matmul %23, %22, %cst_10 {dimension_numbers = #tpu.dot_dimension_numbers<[2], [1], [1], [2], [0, 0, 0, 1, 1, 2], [0], [0]>} : vector<2x1x16xf32>, vector<2x16x16xf32>, vector<2x1x16xf32> -> vector<2x1x16xf32>
    %25 = vector.shape_cast %24 : vector<2x1x16xf32> to vector<2x16xf32>
    %26 = vector.shape_cast %15 : vector<2x16xf32> to vector<2x1x16xf32>
    %cst_11 = arith.constant dense<0.000000e+00> : vector<2x1x16xf32>
    %27 = tpu.matmul %26, %22, %cst_11 {dimension_numbers = #tpu.dot_dimension_numbers<[2], [1], [1], [2], [0, 0, 0, 1, 1, 2], [0], [0]>} : vector<2x1x16xf32>, vector<2x16x16xf32>, vector<2x1x16xf32> -> vector<2x1x16xf32>
    %28 = vector.shape_cast %27 : vector<2x1x16xf32> to vector<2x16xf32>
    %29 = arith.mulf %25, %15 : vector<2x16xf32>
    %cst_12 = arith.constant 1.000000e+00 : f32
    %30 = vector.broadcast %cst_12 : f32 to vector<2x16xf32>
    %31 = arith.addf %30, %29 : vector<2x16xf32>
    %32 = arith.cmpf ogt, %31, %28 : vector<2x16xf32>
    %cst_13 = arith.constant 0.000000e+00 : f32
    %33 = vector.broadcast %cst_13 : f32 to vector<2x16xf32>
    %34 = arith.select %32, %25, %33 : vector<2x16xi1>, vector<2x16xf32>
    %cst_14 = arith.constant dense<0xFF800000> : vector<2xf32>
    %35 = vector.multi_reduction <maximumf>, %34, %cst_14 [1] : vector<2x16xf32> to vector<2xf32>
    %36 = vector.shape_cast %35 : vector<2xf32> to vector<2x1xf32>
    %37 = vector.broadcast %36 : vector<2x1xf32> to vector<2x16xf32>
    %38 = arith.cmpf oge, %25, %37 : vector<2x16xf32>
    %39 = arith.andi %32, %38 : vector<2x16xi1>
    %cst_15 = arith.constant -1.000000e+30 : f32
    %40 = vector.broadcast %cst_15 : f32 to vector<2x16xf32>
    %41 = arith.select %39, %28, %40 : vector<2x16xi1>, vector<2x16xf32>
    %cst_16 = arith.constant dense<0xFF800000> : vector<2xf32>
    %42 = vector.multi_reduction <maximumf>, %41, %cst_16 [1] : vector<2x16xf32> to vector<2xf32>
    %43 = vector.shape_cast %42 : vector<2xf32> to vector<2x1xf32>
    %cst_17 = arith.constant 1.000000e+00 : f32
    %44 = vector.broadcast %cst_17 : f32 to vector<2x1xf32>
    %45 = arith.subf %43, %44 : vector<2x1xf32>
    %46 = arith.divf %45, %36 : vector<2x1xf32>
    %47 = vector.broadcast %46 : vector<2x1xf32> to vector<2x16xf32>
    %48 = arith.subf %15, %47 : vector<2x16xf32>
    %cst_18 = arith.constant 0.000000e+00 : f32
    %49 = vector.broadcast %cst_18 : f32 to vector<2x16xf32>
    %50 = arith.maximumf %48, %49 : vector<2x16xf32>
    %cst_19 = arith.constant dense<0.000000e+00> : vector<2x32xf32>
    %51 = tpu.matmul %50, %0, %cst_19 {dimension_numbers = #tpu.dot_dimension_numbers<[1], [0], [0], [1], [0, 0, 1, 1], [], []>} : vector<2x16xf32>, vector<16x32xf32>, vector<2x32xf32> -> vector<2x32xf32>
    %c0_20 = arith.constant 0 : index
    %c0_21 = arith.constant 0 : index
    %52 = vector.load %arg4[%c0_20, %c0_21] : memref<2x32xf32, #tpu.memory_space<vmem>>, vector<2x32xf32>
    tpu.vector_store %arg4[%c0_20, %c0_21], %51 {strides = array<i32>} : memref<2x32xf32, #tpu.memory_space<vmem>>, vector<2x32xf32>,
    return
  }
  func.func @transform_0(%arg0: i32) -> (i32, i32, i32) {
    %c0_i32 = arith.constant 0 : i32
    %c0_i32_0 = arith.constant 0 : i32
    %c0_i32_1 = arith.constant 0 : i32
    return %arg0, %c0_i32, %c0_i32_0 : i32, i32, i32
  }
  func.func @transform_1(%arg0: i32) -> (i32, i32) {
    %c0_i32 = arith.constant 0 : i32
    %c0_i32_0 = arith.constant 0 : i32
    %c0_i32_1 = arith.constant 0 : i32
    return %c0_i32, %c0_i32_0 : i32, i32
  }
  func.func @transform_2(%arg0: i32) -> (i32, i32) {
    %c0_i32 = arith.constant 0 : i32
    %c0_i32_0 = arith.constant 0 : i32
    return %arg0, %c0_i32 : i32, i32
  }
  func.func @transform_3(%arg0: i32) -> (i32, i32) {
    %c0_i32 = arith.constant 0 : i32
    %c0_i32_0 = arith.constant 0 : i32
    return %arg0, %c0_i32 : i32, i32
  }
}

</mosaic_0001>

<bundles_post_ra>
// kernel: tpu_custom_call.1
= control target key start
LH: loop header
LB: loop body
LE: loop exit
PB: predicated region body
PF: predicated region fallthrough
CT: control target
= control target key end

     0   :  { %8 = vsyncpa [#allocation3], 0  ;;  %s944_s0 = inlined_call_operand.hbm [shape: f32[2,8,32], index: 0, kind: input, shape index: {}]   ;;  %s945_s1 = inlined_call_operand.hbm [shape: f32[16,32], index: 1, kind: input, shape index: {}]   ;;  %s946_s2 = inlined_call_operand.vmem [shape: f32[2,8], index: 2, kind: input, shape index: {}]   ;;  %s947_s3 = inlined_call_operand.hbm [shape: f32[2,32], index: 3, kind: output, shape index: {}]  }
   0x1   :  { %9 = vsyncpa [#allocation6], 0 }
   0x2   :  { %10 = vsyncpa [#allocation4], 0  ;;  %s833_s12 = smov [#allocation2]   ;;  %s761_s16 = scalar_lea.hbm %s944_s0, 256 }
   0x3   :  { %s16_s13 = sshll.u32 %s833_s12, 4  ;;  %p762_p0 = scmp.ne.s32.totalorder %s944_s0, %s761_s16  ;;  %s17_s13 = int_to_ptr.vmem [resolvable:$true] %s16_s13 }
   0x4   :  { %p765_p1 = scmp.lt.u32.totalorder %s761_s16, %s944_s0 }
   0x6   :  { %p767_p2 = pnand %p765_p1, %p762_p0 }
   0x8   :  { %770 = shalt.err (!%p767_p2)
}
   0x9   :  { %s771_s21 = scalar_lea.vmem %s17_s13, 256  ;;  %p776_p4 = scmp.lt.s32.totalorder %s17_s13, %s17_s13 }
   0xa   :  { %p772_p3 = scmp.ne.s32.totalorder %s17_s13, %s771_s21  ;;  %p777_p5 = scmp.lt.s32.totalorder %s771_s21, %s771_s21 }
   0xc   :  { %p778_p6 = por %p777_p5, %p776_p4 }
   0xe   :  { %p779_p7 = pnand %p778_p6, %p772_p3 }
  0x10   :  { %782 = shalt.err (!%p779_p7)
}
  0x11   :  { %s834_s22 = smov 128   ;;  %s835_s23 = smov 8  }
  0x12   :  { %22 = dma.hbm_to_vmem [thread:$0]  %s944_s0, 256, %s17_s13, [#allocation3], %s834_s22, %s834_s22, %s835_s23  }
  0x13   :  { %s836_s26 = smov [#allocation5]   ;;  %s783_s30 = scalar_lea.hbm %s945_s1, 256 }
  0x14   :  { %s28_s27 = sshll.u32 %s836_s26, 4  ;;  %p784_p8 = scmp.ne.s32.totalorder %s945_s1, %s783_s30  ;;  %s29_s27 = int_to_ptr.vmem [resolvable:$true] %s28_s27 }
  0x15   :  { %p787_p9 = scmp.lt.u32.totalorder %s783_s30, %s945_s1 }
  0x17   :  { %p789_p10 = pnand %p787_p9, %p784_p8 }
  0x19   :  { %792 = shalt.err (!%p789_p10)
}
  0x1a   :  { %s793_s8 = scalar_lea.vmem %s29_s27, 256  ;;  %p798_p12 = scmp.lt.s32.totalorder %s29_s27, %s29_s27 }
  0x1b   :  { %p794_p11 = scmp.ne.s32.totalorder %s29_s27, %s793_s8  ;;  %p799_p13 = scmp.lt.s32.totalorder %s793_s8, %s793_s8 }
  0x1d   :  { %p800_p0 = por %p799_p13, %p798_p12 }
  0x1f   :  { %p801_p1 = pnand %p800_p0, %p794_p11 }
  0x21   :  { %804 = shalt.err (!%p801_p1)
}
  0x22   :  { %34 = dma.hbm_to_vmem [thread:$0]  %s945_s1, 256, %s29_s27, [#allocation6], %s834_s22, %s834_s22, %s835_s23  }
  0x23   :  { %827 = dma.done.wait [#allocation3], 256  }
  0x24   :  { %828 = vsyncadd [#allocation3], 4294967040 }
  0x25   :  { %829 = dma.done.wait [#allocation6], 256  }
  0x26   :  { %830 = vsyncadd [#allocation6], 4294967040  ;;  %v49_v0 = vlaneseq  ;;  %vm65_vm0 = vcmask 261120   ;;  %v45_v3 = vld [vmem:[%s946_s2] sm:$0x3]  ;;  %v43_v4 = vld [vmem:[#allocation5] sm:$0xff] }
  0x27   :  { %vm729_vm1 = vmpackc.low %vm65_vm0, %vm65_vm0  ;;  %v44_v5 = vld [vmem:[#allocation5 + $0x8] sm:$0xff]  ;;  %v46_v6 = vmul.f32 0.0001767767, %v45_v3  ;;  %v47_v11 = vld [vmem:[#allocation2] sm:$0xff]  ;;  %vm153_vm2 = vcmask 130048   ;;  %vm170_vm3 = vcmask 1041409  }
  0x28   :  { %v50_v1 = vshrl.u32 %v49_v0, 7  ;;  %v892_v8 = vpack.c.bf16 %v44_v5, %v43_v4  ;;  %v48_v14 = vld [vmem:[#allocation2 + $0x8] sm:$0xff]  ;;  %vm173_vm4 = vcmask 123904   ;;  %v837_v35 = vmov 0.0|0.0   ;;  %s842_s1 = smov [#allocation7]  }
  0x29   :  { %734 = vmatprep.subr.bf16.mxu1 %v837_v35  ;;  %vm838_vm5 = vmmov 0   ;;  %v839_v36 = vmov 0.0   ;;  %v840_v45 = vmov 1.0|1.0   ;;  %v841_v47 = vmov 1.0   ;;  %s635_s2 = sshll.u32 %s842_s1, 4  ;;  %s636_s2 = int_to_ptr.vmem [resolvable:$true] %s635_s2 }
  0x2a   :  { %v51_v2 = vsub.s32 0, %v50_v1  ;;  %v58_v7 = vsub.s32 1, %v50_v1  ;;  %730 = vmatprep.subr.msk.bf16.mxu0 %vm729_vm1, %v892_v8  ;;  %697 = vmatprep.mubr.msk.f32.mxu1 %vm838_vm5, %v839_v36  ;;  %s805_s12 = scalar_lea.vmem %s636_s2, 32  ;;  %p810_p3 = scmp.lt.s32.totalorder %s636_s2, %s636_s2 }
  0x2b   :  { %733 = vmatpush3.bf16.xpose.msk.msra.mxu0 %vm729_vm1, %v892_v8  ;;  %p806_p2 = scmp.ne.s32.totalorder %s636_s2, %s805_s12  ;;  %p811_p4 = scmp.lt.s32.totalorder %s805_s12, %s805_s12 }
  0x2c   :  { %v52_v9 = vrot.slane %v46_v6, %v51_v2  ;;  %v59_v10 = vrot.slane %v46_v6, %v58_v7  ;;  %740 = vmatprep.subr.bf16.mxu0 %v837_v35 }
  0x2d   :  { %p812_p5 = por %p811_p4, %p810_p3 }
  0x2e   :  { %54 = vbcast.lane.b32.xlu0 %v52_v9, 256 }
  0x2f   :  { %p813_p6 = pnand %p812_p5, %p806_p2 }
  0x32   :  { %61 = vbcast.lane.b32.xlu0 %v59_v10, 256 }
  0xa0   :  { %v55_v12 = vpop.permute.xlu0 %54 }
  0xa1   :  { %v63_v13 = vmul.f32 %v55_v12, %v47_v11 }
  0xa3   :  { %690 = vmatprep.mubr.msk.f32.mxu0 %vm65_vm0, %v63_v13 }
  0xa4   :  { %v62_v15 = vpop.permute.xlu0 %61 }
  0xa5   :  { %v64_v16 = vmul.f32 %v62_v15, %v48_v14 }
  0xa7   :  { %691 = vmatmul.mubr.msk.f32.vlgmr.msra.gmra.mrb[0].mxu0 %vm65_vm0, %v64_v16 }
  0xa8   :  { %711 = vmatprep.mubr.msk.f32.mxu0 %vm838_vm5, %v839_v36 }
 0x17a   :  { %v692_v17 = vpop.f32.mrb[0].mxu0 }
 0x17b   :  { %v161_v18 = vsel %vm153_vm2, %v692_v17, -inf  ;;  %v144_v19 = vpop.f32.mrb[1].mxu0 }
 0x17c   :  { %v162_v20 = vrot.slane %v161_v18, 4  ;;  %v154_v21 = vsel %vm153_vm2, %v144_v19, -inf }
 0x17d   :  { %v155_v22 = vrot.slane %v154_v21, 4 }
 0x17e   :  { %v163_v23 = vmax.f32 %v161_v18, %v162_v20 }
 0x17f   :  { %v156_v24 = vmax.f32 %v154_v21, %v155_v22 }
 0x180   :  { %v164_v25 = vrot.slane %v163_v23, 2 }
 0x181   :  { %v157_v26 = vrot.slane %v156_v24, 2 }
 0x182   :  { %v165_v27 = vmax.f32 %v163_v23, %v164_v25 }
 0x183   :  { %v158_v28 = vmax.f32 %v156_v24, %v157_v26 }
 0x184   :  { %v166_v29 = vrot.slane %v165_v27, 1 }
 0x185   :  { %v159_v30 = vrot.slane %v158_v28, 1 }
 0x186   :  { %v167_v31 = vmax.f32 %v165_v27, %v166_v29 }
 0x187   :  { %v160_v32 = vmax.f32 %v158_v28, %v159_v30 }
 0x189   :  { %v171_v33 = vsel %vm170_vm3, %v167_v31, %v160_v32 }
 0x18a   :  { %v174_v34 = vsel %vm173_vm4, %v171_v33, -inf }
 0x18b   :  { %175 = vmax.xlane.f32.xlu1 %v174_v34 }
 0x218   :  { %v176_v37 = vpop.xlane.xlu1 %175 }
 0x219   :  { %v178_v38 = vrot.slane %v176_v37, 1  ;;  %v904_v39 = vsub.f32 %v160_v32, %v176_v37 }
 0x21b   :  { %v906_v40 = vsub.f32 %v167_v31, %v178_v38  ;;  %v186_v41 = vrot.slane %v904_v39, %v51_v2 }
 0x21d   :  { %192 = vbcast.lane.b32.xlu0 %v186_v41, 264  ;;  %188 = vbcast.lane.b32.xlu1 %v186_v41, 256  ;;  %v197_v42 = vrot.slane %v906_v40, %v51_v2 }
 0x221   :  { %199 = vbcast.lane.b32.xlu0 %v197_v42, 256 }
 0x225   :  { %203 = vbcast.lane.b32.xlu0 %v197_v42, 264 }
 0x28f   :  { %v193_v43 = vpop.permute.xlu0 %192  ;;  %v189_v44 = vpop.permute.xlu1 %188 }
 0x290   :  { %vm206_vm6 = vcmp.ge.f32.partialorder %v193_v43, %v186_v41  ;;  %vm205_vm7 = vcmp.ge.f32.partialorder %v189_v44, %v186_v41 }
 0x291   :  { %vm735_vm8 = vmpackc.low %vm206_vm6, %vm205_vm7 }
 0x292   :  { %736 = vmatpush3.bf16.msk.msra.mxu1 %vm735_vm8, %v840_v45  ;;  %742 = vmatpush3.bf16.msk.msra.mxu0 %vm735_vm8, %v840_v45 }
 0x293   :  { %v200_v46 = vpop.permute.xlu0 %199  ;;  %737 = vmatprep.subr.bf16.mxu1 %v837_v35  ;;  %746 = vmatprep.subr.bf16.mxu0 %v837_v35 }
 0x294   :  { %vm207_vm9 = vcmp.ge.f32.partialorder %v200_v46, %v197_v42 }
 0x295   :  { %698 = vmatmul.mubr.msk.f32.vlgmr.msra.gmra.mrb[0].mxu1 %vm153_vm2, %v841_v47  ;;  %712 = vmatmul.mubr.msk.f32.vlgmr.msra.gmra.mrb[2].mxu0 %vm153_vm2, %v904_v39 }
 0x296   :  { %704 = vmatprep.mubr.msk.f32.mxu1 %vm838_vm5, %v839_v36  ;;  %748 = vmatpush3.bf16.msra.mxu0 %v892_v8 }
 0x297   :  { %v204_v48 = vpop.permute.xlu0 %203  ;;  %725 = vmatprep.mubr.msk.f32.mxu0 %vm838_vm5, %v839_v36 }
 0x298   :  { %vm208_vm10 = vcmp.ge.f32.partialorder %v204_v48, %v197_v42 }
 0x299   :  { %vm738_vm11 = vmpackc.low %vm208_vm10, %vm207_vm9 }
 0x29a   :  { %739 = vmatpush3.bf16.msk.msra.mxu1 %vm738_vm11, %v840_v45 }
 0x29b   :  { %743 = vmatprep.subr.bf16.mxu1 %v837_v35 }
 0x29d   :  { %705 = vmatmul.mubr.msk.f32.vlgmr.msra.gmra.mrb[2].mxu1 %vm153_vm2, %v841_v47 }
 0x29e   :  { %745 = vmatpush3.bf16.msk.msra.mxu1 %vm738_vm11, %v840_v45  ;;  %718 = vmatprep.mubr.msk.f32.mxu1 %vm838_vm5, %v839_v36 }
 0x2a1   :  { %719 = vmatmul.mubr.msk.f32.vlgmr.msra.gmra.mrb[4].mxu1 %vm153_vm2, %v906_v40 }
 0x368   :  { %v286_v49 = vpop.f32.mrb[0].mxu1  ;;  %v429_v50 = vpop.f32.mrb[2].mxu0 }
 0x369   :  { %v506_v51 = vmul.f32 %v286_v49, %v904_v39  ;;  %v713_v52 = vpop.f32.mrb[3].mxu0  ;;  %v699_v53 = vpop.f32.mrb[1].mxu1 }
 0x36b   :  { %v508_v54 = vadd.f32 1.0, %v506_v51 }
 0x36d   :  { %vm510_vm12 = vcmp.gt.f32.partialorder %v508_v54, %v429_v50 }
 0x36e   :  { %v512_v63 = vsel %vm510_vm12, %v286_v49, 0.0 }
 0x370   :  { %v356_v55 = vpop.f32.mrb[2].mxu1 }
 0x371   :  { %v507_v56 = vmul.f32 %v356_v55, %v906_v40  ;;  %v706_v57 = vpop.f32.mrb[3].mxu1 }
 0x373   :  { %v509_v58 = vadd.f32 1.0, %v507_v56 }
 0x374   :  { %v502_v59 = vpop.f32.mrb[4].mxu1 }
 0x375   :  { %vm511_vm13 = vcmp.gt.f32.partialorder %v509_v58, %v502_v59  ;;  %v720_v60 = vpop.f32.mrb[5].mxu1 }
 0x376   :  { %v513_v61 = vsel %vm511_vm13, %v356_v55, 0.0 }
 0x377   :  { %v516_v62 = vrot.slane %v513_v61, 7 }
 0x379   :  { %v517_v0 = vsel %vm170_vm3, %v516_v62, %v512_v63 }
 0x37a   :  { %v519_v1 = vsel %vm173_vm4, %v517_v0, -inf }
 0x37b   :  { %520 = vmax.xlane.f32.xlu0 %v519_v1 }
 0x408   :  { %v521_v2 = vpop.xlane.xlu0 %520 }
 0x409   :  { %v523_v3 = vrot.slane %v521_v2, 1  ;;  %vm526_vm14 = vcmp.ge.f32.partialorder %v286_v49, %v521_v2  ;;  %759 = vrcp.f32 %v521_v2 }
 0x40a   :  { %vm528_vm15 = vmand %vm510_vm12, %vm526_vm14 }
 0x40b   :  { %vm527_vm0 = vcmp.ge.f32.partialorder %v356_v55, %v523_v3  ;;  %v530_v4 = vsel %vm528_vm15, %v429_v50, -1e+30 }
 0x40c   :  { %vm529_vm1 = vmand %vm511_vm13, %vm527_vm0 }
 0x40d   :  { %v531_v5 = vsel %vm529_vm1, %v502_v59, -1e+30 }
 0x40e   :  { %v534_v6 = vrot.slane %v531_v5, 7 }
 0x410   :  { %v535_v7 = vsel %vm170_vm3, %v534_v6, %v530_v4 }
 0x411   :  { %v537_v8 = vsel %vm173_vm4, %v535_v7, -inf  ;;  %vm627_vm4 = vcmask 254976  }
 0x412   :  { %538 = vmax.xlane.f32.xlu1 %v537_v8 }
 0x413   :  { %v760_v11 = vpop.eup %759 }
 0x49f   :  { %v539_v9 = vpop.xlane.xlu1 %538 }
 0x4a0   :  { %v665_v10 = vadd.f32 -1.0, %v539_v9 }
 0x4a2   :  { %v542_v12 = vmul.f32 %v760_v11, %v665_v10 }
 0x4a4   :  { %v544_v13 = vrot.slane %v542_v12, 1  ;;  %v547_v14 = vsub.f32 %v904_v39, %v542_v12 }
 0x4a6   :  { %v548_v15 = vsub.f32 %v906_v40, %v544_v13  ;;  %v549_v17 = vmax.f32 %v547_v14, 0.0 }
 0x4a8   :  { %v550_v16 = vmax.f32 %v548_v15, 0.0 }
 0x4aa   :  { %v553_v18 = vrot.slane %v550_v16, 7 }
 0x4ac   :  { %v554_v19 = vsel %vm170_vm3, %v553_v18, %v549_v17 }
 0x4ad   :  { %726 = vmatmul.mubr.msk.f32.vlgmr.msra.gmra.mrb[4].mxu0 %vm153_vm2, %v554_v19 }
 0x580   :  { %v623_v20 = vpop.f32.mrb[4].mxu0 }
 0x581   :  { %v727_v21 = vpop.f32.mrb[5].mxu0  ;;  %628 = vst.msk [vmem:[#allocation7] sm:$0x3] %vm627_vm4, %v623_v20 }
 0x582   :  { %816 = shalt.err (!%p813_p6)
}
 0x583   :  { %s817_s15 = scalar_lea.hbm %s947_s3, 32 }
 0x584   :  { %p818_p7 = scmp.ne.s32.totalorder %s947_s3, %s817_s15  ;;  %p821_p8 = scmp.lt.u32.totalorder %s817_s15, %s947_s3 }
 0x586   :  { %p823_p9 = pnand %p821_p8, %p818_p7 }
 0x588   :  { %826 = shalt.err (!%p823_p9)
}
 0x589   :  { %638 = dma.vmem_to_hbm [thread:$0]  %s636_s2, 32, %s947_s3, [#allocation4]  }
 0x58a   :  { %831 = dma.done.wait [#allocation4], 32  }
 0x58b   :  { %832 = vsyncadd [#allocation4], 4294967264 }
 0x58c   :  { %642 = vsyncpa [#allocation3], 1 }
 0x58d   :  { %643 = vsyncpa [#allocation6], 1 }
 0x58e   :  { %644 = vsyncpa [#allocation4], 1 }

</bundles_post_ra>
